<compile_context>
chip_gen: v6e
topology: v6e:2x2x1
jax: 0.10.0
libtpu: 0.0.40
codegen_flags: <defaults>
</compile_context>

<pallas_src>
import functools

import jax
import jax.numpy as jnp
from jax import lax
from jax.experimental import pallas as pl
from jax.experimental.pallas import tpu as pltpu


def make_cnn_kernel(kernel_sizes, B, L, D, V, Co, C):
    """Builds the fused gather/conv/maxpool/relu/linear kernel body."""
    kernel_sizes = tuple(kernel_sizes)
    T = sum(kernel_sizes)          # total number of taps across all branches
    BL = B * L

    # static lane offsets (in tap units) of each branch inside W_all's N dim
    offsets = []
    off = 0
    for K in kernel_sizes:
        offsets.append(off)
        off += K

    def kernel(ids_ref, embed_ref, wall_ref, ball_ref, fcw_ref, fcb_ref, out_ref):
        # ---- fused embedding gather: one-hot (BL, V) @ (V, D) on the MXU ----
        ids = ids_ref[...]                                          # (BL, 1) int32
        vocab_iota = lax.broadcasted_iota(jnp.int32, (BL, V), 1)    # (BL, V)
        one_hot = (ids == vocab_iota).astype(jnp.float32)           # (BL, V)
        emb = jnp.dot(one_hot, embed_ref[...],
                      preferred_element_type=jnp.float32)           # (BL, D)

        # ---- ONE matmul over all taps of all conv branches ----
        # wall_ref: (D, T*Co); column (off_i + k)*Co + c holds w_i[k, d, c].
        taps = jnp.dot(emb, wall_ref[...],
                       preferred_element_type=jnp.float32)          # (BL, T*Co)
        # (BL, T*Co) -> (B, L, T*Co): L=16 is a multiple of 8, so the split
        # lands on sublane-tile boundaries (no relayout).
        taps3 = taps.reshape(B, L, T * Co)

        # ---- per-branch shifted adds on the narrow Co-lane tap results ----
        pooled_parts = []
        for i, K in enumerate(kernel_sizes):
            off_i = offsets[i]
            Lout = L - K + 1
            # s_i[b, l, c] = sum_k taps3[b, l+k, (off_i+k)*Co + c]
            acc = taps3[:, 0:Lout, off_i * Co:(off_i + 1) * Co]     # tap k = 0
            for k in range(1, K):
                acc = acc + taps3[:, k:k + Lout,
                                  (off_i + k) * Co:(off_i + k + 1) * Co]
            # max-pool over length FIRST; bias + ReLU applied later on the
            # pooled (B, Co) features (bias constant over length + ReLU
            # monotone => identical to reference).  Do NOT add any
            # length-varying term before this pool.
            pooled_parts.append(jnp.max(acc, axis=1))               # (B, Co)

        # ---- concat -> single bias+ReLU -> single FC matmul ----
        feat = jnp.concatenate(pooled_parts, axis=-1)               # (B, nKs*Co)
        feat = jnp.maximum(feat + ball_ref[...], 0.0)
        logits = jnp.dot(feat, fcw_ref[...],
                         preferred_element_type=jnp.float32) + fcb_ref[...]

        # NOTE: dropout is identity in eval/inference mode, so it is omitted.
        # C=4 < 128 lanes -> masked partial store; negligible at B=2 (see TODO).
        out_ref[...] = logits.astype(out_ref.dtype)

    return kernel


def cnn_forward(token_ids, params, kernel_sizes):
    """Full forward pass of the text CNN, fused into one Pallas kernel.

    token_ids: (B, L) int32
    params: dict with 'embed' (V, D), 'conv_w' list of (K, D, Co),
            'conv_b' list of (1, Co), 'fc_w' (len(Ks)*Co, C), 'fc_b' (1, C)
    """
    B, L = token_ids.shape
    V, D = params["embed"].shape
    Co = params["conv_w"][0].shape[-1]
    C = params["fc_w"].shape[-1]
    Ks = tuple(kernel_sizes)
    assert L >= max(Ks), "sequence length must be >= largest conv kernel"

    kernel = make_cnn_kernel(Ks, B, L, D, V, Co, C)

    # Token ids as a (B*L, 1) int32 column so the in-kernel one-hot compare
    # broadcasts along lanes with no relayout.
    ids2d = token_ids.reshape(B * L, 1).astype(jnp.int32)

    # Pack ALL taps of ALL branches along N (lane-dense):
    #   w_i: (K, D, Co) -> (D, K*Co); concat branches -> (D, sum(K)*Co).
    # Column (off_i + k)*Co + c  <->  w_i[k, d, c]   (matches kernel indexing).
    w_all = jnp.concatenate(
        [w.astype(jnp.float32).transpose(1, 0, 2).reshape(D, K * Co)
         for K, w in zip(Ks, params["conv_w"])],
        axis=1,
    )
    # Pack conv biases into one (1, len(Ks)*Co) row.
    b_all = jnp.concatenate(
        [b.astype(jnp.float32) for b in params["conv_b"]], axis=1)

    inputs = [
        ids2d,
        params["embed"].astype(jnp.float32),
        w_all,
        b_all,
        params["fc_w"].astype(jnp.float32),
        params["fc_b"].astype(jnp.float32),
    ]

    vmem_spec = pl.BlockSpec(memory_space=pltpu.MemorySpace.VMEM)
    out = pl.pallas_call(
        kernel,
        out_shape=jax.ShapeDtypeStruct((B, C), jnp.float32),
        in_specs=[vmem_spec] * len(inputs),
        out_specs=vmem_spec,
    )(*inputs)
    return out


def cnn_reference(token_ids, params, kernel_sizes):
    """Pure-JAX reference (mirrors the PyTorch forward, eval mode)."""
    emb = jnp.take(params["embed"], token_ids, axis=0).astype(jnp.float32)  # (B, L, D)
    B, L, D = emb.shape
    feats = []
    for (K, w, b) in zip(kernel_sizes, params["conv_w"], params["conv_b"]):
        Lout = L - K + 1
        s = jnp.zeros((B, Lout, w.shape[-1]), jnp.float32)
        for k in range(K):
            s = s + jnp.einsum("bld,dc->blc", emb[:, k:k + Lout, :], w[k])
        s = jnp.maximum(s + b[None, :, :], 0.0)
        feats.append(jnp.max(s, axis=1))
    feat = jnp.concatenate(feats, axis=1)
    return feat @ params["fc_w"] + params["fc_b"]


if __name__ == "__main__":
    # Small, forward-consistent shapes.
    V, D, C, Co = 50, 32, 4, 8          # vocab, embed_dim, class_num, kernel_num
    Ks = (3, 4, 5)                      # kernel_sizes
    B, L = 2, 16                        # batch, sequence length
    drop_out = 0.5                      # identity at inference

    key = jax.random.PRNGKey(0)
    keys = jax.random.split(key, 3 + 2 * len(Ks))

    params = {
        "embed": jax.random.normal(keys[0], (V, D), jnp.float32) * 0.1,
        "conv_w": [
            jax.random.normal(keys[1 + i], (K, D, Co), jnp.float32) * 0.1
            for i, K in enumerate(Ks)
        ],
        "conv_b": [
            jax.random.normal(keys[1 + len(Ks) + i], (1, Co), jnp.float32) * 0.1
            for i in range(len(Ks))
        ],
        "fc_w": jax.random.normal(keys[-2], (len(Ks) * Co, C), jnp.float32) * 0.1,
        "fc_b": jax.random.normal(keys[-1], (1, C), jnp.float32) * 0.1,
    }

    token_ids = jax.random.randint(key, (B, L), 0, V, dtype=jnp.int32)

    fwd = jax.jit(functools.partial(cnn_forward, kernel_sizes=Ks))
    logits = fwd(token_ids, params)
    jax.block_until_ready(logits)

    ref = cnn_reference(token_ids, params, Ks)
    assert logits.shape == (B, C)
    assert jnp.allclose(logits, ref, atol=1e-4, rtol=1e-4), (logits, ref)

    print("KERNEL_OK")
</pallas_src>

<mosaic_0001>
module attributes {stable_mosaic.version = 11 : i64} {
  func.func @kernel(%arg0: memref<32x1xi32, #tpu.memory_space<vmem>>, %arg1: memref<50x32xf32, #tpu.memory_space<vmem>>, %arg2: memref<32x96xf32, #tpu.memory_space<vmem>>, %arg3: memref<1x24xf32, #tpu.memory_space<vmem>>, %arg4: memref<24x4xf32, #tpu.memory_space<vmem>>, %arg5: memref<1x4xf32, #tpu.memory_space<vmem>>, %arg6: memref<2x4xf32, #tpu.memory_space<vmem>>) attributes {dimension_semantics = [], scalar_prefetch = 0 : i64, scratch_operands = 0 : i64, tpu.core_type = #tpu.core_type<tc>} {
    %c0 = arith.constant 0 : index
    %c0_0 = arith.constant 0 : index
    %0 = vector.load %arg0[%c0, %c0_0] : memref<32x1xi32, #tpu.memory_space<vmem>>, vector<32x1xi32>
    %1 = tpu.iota {dimensions = array<i32: 1>} : vector<32x50xi32>
    %2 = vector.broadcast %0 : vector<32x1xi32> to vector<32x50xi32>
    %3 = arith.cmpi eq, %2, %1 : vector<32x50xi32>
    %4 = arith.extui %3 : vector<32x50xi1> to vector<32x50xi32>
    %5 = arith.sitofp %4 : vector<32x50xi32> to vector<32x50xf32>
    %c0_1 = arith.constant 0 : index
    %c0_2 = arith.constant 0 : index
    %6 = vector.load %arg1[%c0_1, %c0_2] : memref<50x32xf32, #tpu.memory_space<vmem>>, vector<50x32xf32>
    %cst = arith.constant dense<0.000000e+00> : vector<32x32xf32>
    %7 = tpu.matmul %5, %6, %cst {dimension_numbers = #tpu.dot_dimension_numbers<[1], [0], [0], [1], [0, 0, 1, 1], [], []>} : vector<32x50xf32>, vector<50x32xf32>, vector<32x32xf32> -> vector<32x32xf32>
    %c0_3 = arith.constant 0 : index
    %c0_4 = arith.constant 0 : index
    %8 = vector.load %arg2[%c0_3, %c0_4] : memref<32x96xf32, #tpu.memory_space<vmem>>, vector<32x96xf32>
    %cst_5 = arith.constant dense<0.000000e+00> : vector<32x96xf32>
    %9 = tpu.matmul %7, %8, %cst_5 {dimension_numbers = #tpu.dot_dimension_numbers<[1], [0], [0], [1], [0, 0, 1, 1], [], []>} : vector<32x32xf32>, vector<32x96xf32>, vector<32x96xf32> -> vector<32x96xf32>
    %10 = vector.shape_cast %9 : vector<32x96xf32> to vector<2x16x96xf32>
    %11 = vector.extract_strided_slice %10 {offsets = [0, 0, 0], sizes = [2, 14, 8], strides = [1, 1, 1]} : vector<2x16x96xf32> to vector<2x14x8xf32>
    %12 = vector.extract_strided_slice %10 {offsets = [0, 1, 8], sizes = [2, 14, 8], strides = [1, 1, 1]} : vector<2x16x96xf32> to vector<2x14x8xf32>
    %13 = arith.addf %11, %12 : vector<2x14x8xf32>
    %14 = vector.extract_strided_slice %10 {offsets = [0, 2, 16], sizes = [2, 14, 8], strides = [1, 1, 1]} : vector<2x16x96xf32> to vector<2x14x8xf32>
    %15 = arith.addf %13, %14 : vector<2x14x8xf32>
    %cst_6 = arith.constant dense<0xFF800000> : vector<2x8xf32>
    %16 = vector.multi_reduction <maximumf>, %15, %cst_6 [1] : vector<2x14x8xf32> to vector<2x8xf32>
    %17 = vector.extract_strided_slice %10 {offsets = [0, 0, 24], sizes = [2, 13, 8], strides = [1, 1, 1]} : vector<2x16x96xf32> to vector<2x13x8xf32>
    %18 = vector.extract_strided_slice %10 {offsets = [0, 1, 32], sizes = [2, 13, 8], strides = [1, 1, 1]} : vector<2x16x96xf32> to vector<2x13x8xf32>
    %19 = arith.addf %17, %18 : vector<2x13x8xf32>
    %20 = vector.extract_strided_slice %10 {offsets = [0, 2, 40], sizes = [2, 13, 8], strides = [1, 1, 1]} : vector<2x16x96xf32> to vector<2x13x8xf32>
    %21 = arith.addf %19, %20 : vector<2x13x8xf32>
    %22 = vector.extract_strided_slice %10 {offsets = [0, 3, 48], sizes = [2, 13, 8], strides = [1, 1, 1]} : vector<2x16x96xf32> to vector<2x13x8xf32>
    %23 = arith.addf %21, %22 : vector<2x13x8xf32>
    %cst_7 = arith.constant dense<0xFF800000> : vector<2x8xf32>
    %24 = vector.multi_reduction <maximumf>, %23, %cst_7 [1] : vector<2x13x8xf32> to vector<2x8xf32>
    %25 = vector.extract_strided_slice %10 {offsets = [0, 0, 56], sizes = [2, 12, 8], strides = [1, 1, 1]} : vector<2x16x96xf32> to vector<2x12x8xf32>
    %26 = vector.extract_strided_slice %10 {offsets = [0, 1, 64], sizes = [2, 12, 8], strides = [1, 1, 1]} : vector<2x16x96xf32> to vector<2x12x8xf32>
    %27 = arith.addf %25, %26 : vector<2x12x8xf32>
    %28 = vector.extract_strided_slice %10 {offsets = [0, 2, 72], sizes = [2, 12, 8], strides = [1, 1, 1]} : vector<2x16x96xf32> to vector<2x12x8xf32>
    %29 = arith.addf %27, %28 : vector<2x12x8xf32>
    %30 = vector.extract_strided_slice %10 {offsets = [0, 3, 80], sizes = [2, 12, 8], strides = [1, 1, 1]} : vector<2x16x96xf32> to vector<2x12x8xf32>
    %31 = arith.addf %29, %30 : vector<2x12x8xf32>
    %32 = vector.extract_strided_slice %10 {offsets = [0, 4, 88], sizes = [2, 12, 8], strides = [1, 1, 1]} : vector<2x16x96xf32> to vector<2x12x8xf32>
    %33 = arith.addf %31, %32 : vector<2x12x8xf32>
    %cst_8 = arith.constant dense<0xFF800000> : vector<2x8xf32>
    %34 = vector.multi_reduction <maximumf>, %33, %cst_8 [1] : vector<2x12x8xf32> to vector<2x8xf32>
    %35 = tpu.concatenate %16, %24, %34 in 1 : vector<2x8xf32>, vector<2x8xf32>, vector<2x8xf32> -> vector<2x24xf32>
    %c0_9 = arith.constant 0 : index
    %c0_10 = arith.constant 0 : index
    %36 = vector.load %arg3[%c0_9, %c0_10] : memref<1x24xf32, #tpu.memory_space<vmem>>, vector<1x24xf32>
    %37 = vector.broadcast %36 : vector<1x24xf32> to vector<2x24xf32>
    %38 = arith.addf %35, %37 : vector<2x24xf32>
    %cst_11 = arith.constant 0.000000e+00 : f32
    %39 = vector.broadcast %cst_11 : f32 to vector<2x24xf32>
    %40 = arith.maximumf %38, %39 : vector<2x24xf32>
    %c0_12 = arith.constant 0 : index
    %c0_13 = arith.constant 0 : index
    %41 = vector.load %arg4[%c0_12, %c0_13] : memref<24x4xf32, #tpu.memory_space<vmem>>, vector<24x4xf32>
    %cst_14 = arith.constant dense<0.000000e+00> : vector<2x4xf32>
    %42 = tpu.matmul %40, %41, %cst_14 {dimension_numbers = #tpu.dot_dimension_numbers<[1], [0], [0], [1], [0, 0, 1, 1], [], []>} : vector<2x24xf32>, vector<24x4xf32>, vector<2x4xf32> -> vector<2x4xf32>
    %c0_15 = arith.constant 0 : index
    %c0_16 = arith.constant 0 : index
    %43 = vector.load %arg5[%c0_15, %c0_16] : memref<1x4xf32, #tpu.memory_space<vmem>>, vector<1x4xf32>
    %44 = vector.broadcast %43 : vector<1x4xf32> to vector<2x4xf32>
    %45 = arith.addf %42, %44 : vector<2x4xf32>
    %c0_17 = arith.constant 0 : index
    %c0_18 = arith.constant 0 : index
    %46 = vector.load %arg6[%c0_17, %c0_18] : memref<2x4xf32, #tpu.memory_space<vmem>>, vector<2x4xf32>
    tpu.vector_store %arg6[%c0_17, %c0_18], %45 {strides = array<i32>} : memref<2x4xf32, #tpu.memory_space<vmem>>, vector<2x4xf32>,
    return
  }
}

</mosaic_0001>

<bundles_post_ra>
// kernel: cnn_forward.1
= control target key start
LH: loop header
LB: loop body
LE: loop exit
PB: predicated region body
PF: predicated region fallthrough
CT: control target
= control target key end

     0   :  { %vm74_vm0 = vcmask 1041408   ;;  %v665_v2 = vmov 0   ;;  %s831_s0 = inlined_call_operand.vmem [shape: s32[32,1], index: 0, kind: input, shape index: {}]   ;;  %s832_s1 = inlined_call_operand.vmem [shape: f32[50,32], index: 1, kind: input, shape index: {}]   ;;  %s833_s2 = inlined_call_operand.vmem [shape: f32[32,96], index: 2, kind: input, shape index: {}]   ;;  %s834_s3 = inlined_call_operand.vmem [shape: f32[1,24], index: 3, kind: input, shape index: {}]   ;;  %s835_s4 = inlined_call_operand.vmem [shape: f32[24,4], index: 4, kind: input, shape index: {}]   ;;  %s836_s5 = inlined_call_operand.vmem [shape: f32[1,4], index: 5, kind: input, shape index: {}]   ;;  %s837_s6 = inlined_call_operand.hbm [shape: f32[2,4], index: 6, kind: output, shape index: {}]  }
   0x1   :  { %v24_v0 = vld [vmem:[%s831_s0] sm:$0xff]  ;;  %v26_v1 = vld [vmem:[%s831_s0 + $0x10] sm:$0xff]  ;;  %641 = vset.pattern.permute.xlu0 %v665_v2  ;;  %642 = vset.pattern.permute.xlu1 %v665_v2  ;;  %v59_v4 = vld [vmem:[%s832_s1 + $0x28] sm:$0xff] }
   0x2   :  { %v60_v3 = vld [vmem:[%s832_s1 + $0x30] sm:$0x3]  ;;  %31 = vperm.xlu0 %641, %v24_v0   ;;  %37 = vperm.xlu1 %642, %v26_v1   ;;  %v25_v5 = vld [vmem:[%s831_s0 + $0x8] sm:$0xff]  ;;  %v27_v6 = vld [vmem:[%s831_s0 + $0x18] sm:$0xff] }
   0x3   :  { %589 = vmatprep.subr.msk.mxu0 %vm74_vm0, %v60_v3 }
   0x4   :  { %11 = vsyncpa [#allocation3], 0  ;;  %590 = vmatpush3.msk.msra.mxu0 %vm74_vm0, %v60_v3  ;;  %v58_v7 = vld [vmem:[%s832_s1 + $0x20] sm:$0xff]  ;;  %v57_v8 = vld [vmem:[%s832_s1 + $0x18] sm:$0xff]  ;;  %v28_v14 = vlaneseq  ;;  %vm61_vm1 = vcmask 408576   ;;  %v666_v18 = vmov 0.0  }
   0x5   :  { %591 = vmatprep.subr.mxu0 %v59_v4  ;;  %v166_v9 = vld [vmem:[%s833_s2 + $0x18] sm:$0xff]  ;;  %v165_v10 = vld [vmem:[%s833_s2 + $0x10] sm:$0xff]  ;;  %v55_v12 = vld [vmem:[%s832_s1 + $0x8] sm:$0xff]  ;;  %vm167_vm6 = vcmask 261120   ;;  %vm269_vm7 = vcmask 1046528   ;;  %s667_s25 = smov 120  }
   0x6   :  { %34 = vperm.xlu0 %641, %v25_v5   ;;  %40 = vperm.xlu1 %642, %v27_v6   ;;  %v56_v11 = vld [vmem:[%s832_s1 + $0x10] sm:$0xff]  ;;  %v54_v13 = vld [vmem:[%s832_s1] sm:$0xff]  ;;  %v29_v15 = vand.u32 127, %v28_v14  ;;  %v164_v25 = vld [vmem:[%s833_s2 + $0x8] sm:$0xff]  ;;  %vm292_vm8 = vcmask 1045504   ;;  %vm335_vm9 = vcmask 1044480  }
   0x7   :  { %592 = vmatpush3.msra.mxu0 %v59_v4  ;;  %609 = vmatprep.subr.mxu1 %v166_v9  ;;  %v163_v26 = vld [vmem:[%s833_s2] sm:$0xff]  ;;  %s668_s2 = smov 112   ;;  %s669_s26 = smov 104   ;;  %vm378_vm10 = vcmask 1043456   ;;  %vm317_vm11 = vcmask 62464   ;;  %vm315_vm12 = vcmask 64512  }
   0x8   :  { %593 = vmatprep.subr.mxu0 %v58_v7  ;;  %610 = vmatpush3.msra.mxu1 %v166_v9  ;;  %s670_s27 = smov 96   ;;  %vm358_vm13 = vcmask 261312   ;;  %vm360_vm14 = vcmask 258240   ;;  %vm401_vm15 = vcmask 523712   ;;  %vm403_vm0 = vcmask 519616   ;;  %s673_s14 = smov [#allocation2]  }
   0x9   :  { %594 = vmatpush3.msra.mxu0 %v58_v7  ;;  %611 = vmatprep.subr.mxu1 %v165_v10  ;;  %s542_s0 = sshll.u32 %s673_s14, 4  ;;  %s543_s0 = int_to_ptr.vmem [resolvable:$true] %s542_s0 }
   0xa   :  { %595 = vmatprep.subr.mxu0 %v57_v8  ;;  %612 = vmatpush3.msra.mxu1 %v165_v10  ;;  %p648_p1 = scmp.lt.s32.totalorder %s543_s0, %s543_s0 }
   0xb   :  { %596 = vmatpush3.msra.mxu0 %v57_v8  ;;  %613 = vmatprep.subr.mxu1 %v164_v25 }
   0xc   :  { %597 = vmatprep.subr.mxu0 %v56_v11  ;;  %614 = vmatpush3.msra.mxu1 %v164_v25 }
   0xd   :  { %598 = vmatpush3.msra.mxu0 %v56_v11  ;;  %615 = vmatprep.subr.mxu1 %v163_v26 }
   0xe   :  { %599 = vmatprep.subr.mxu0 %v55_v12  ;;  %616 = vmatpush3.msra.mxu1 %v163_v26 }
   0xf   :  { %600 = vmatpush3.msra.mxu0 %v55_v12  ;;  %623 = vmatprep.subr.mxu1 %v666_v18 }
  0x10   :  { %601 = vmatprep.subr.mxu0 %v54_v13 }
  0x11   :  { %602 = vmatpush3.msra.mxu0 %v54_v13 }
  0x7d   :  { %v32_v16 = vpop.permute.xlu0 %31  ;;  %v38_v17 = vpop.permute.xlu1 %37 }
  0x7e   :  { %vm42_vm2 = vcmp.eq.s32.totalorder %v32_v16, %v29_v15  ;;  %vm44_vm3 = vcmp.eq.s32.totalorder %v38_v17, %v29_v15 }
  0x7f   :  { %v550_v19 = vsel %vm42_vm2, 1.0, %v666_v18  ;;  %v552_v22 = vsel %vm44_vm3, 1.0, %v666_v18  ;;  %vm671_vm2 = vmmov 0   ;;  %vm439_vm3 = vcmask 130048  }
  0x80   :  { %603 = vmatprep.mubr.msk.f32.mxu0 %vm61_vm1, %v550_v19 }
  0x81   :  { %v35_v20 = vpop.permute.xlu0 %34  ;;  %v41_v21 = vpop.permute.xlu1 %40 }
  0x82   :  { %vm43_vm4 = vcmp.eq.s32.totalorder %v35_v20, %v29_v15  ;;  %vm45_vm5 = vcmp.eq.s32.totalorder %v41_v21, %v29_v15 }
  0x83   :  { %v551_v23 = vsel %vm43_vm4, 1.0, %v666_v18  ;;  %v553_v24 = vsel %vm45_vm5, 1.0, %v666_v18  ;;  %vm460_vm4 = vcmask 195584   ;;  %vm534_vm5 = vcmask 25600  }
  0x84   :  { %604 = vmatmul.mubr.msk.f32.vlgmr.msra.gmra.mxu0 %vm61_vm1, %v551_v23 }
  0x85   :  { %606 = vmatprep.mubr.msk.f32.mxu0 %vm61_vm1, %v552_v22 }
  0x88   :  { %607 = vmatmul.mubr.msk.f32.gmra.mxu0 %vm61_vm1, %v553_v24  ;;  %vm423_vm1 = vcmask 1041409  }
 0x144   :  { %v605_v27 = vpop.f32.mrf.mxu0 }
 0x146   :  { %v144_v28 = vpop.f32.mrf.mxu0 }
 0x147   :  { %617 = vmatprep.mubr.msk.f32.mxu1 %vm167_vm6, %v144_v28 }
 0x148   :  { %618 = vmatmul.mubr.msk.f32.vlgmr.msra.gmra.mxu1 %vm167_vm6, %v605_v27  ;;  %v608_v29 = vpop.f32.mrf.mxu0 }
 0x14a   :  { %v154_v30 = vpop.f32.mrf.mxu0 }
 0x14b   :  { %620 = vmatprep.mubr.msk.f32.mxu1 %vm167_vm6, %v154_v30 }
 0x14c   :  { %621 = vmatmul.mubr.msk.f32.gmra.mxu1 %vm167_vm6, %v608_v29 }
 0x14d   :  { %629 = vmatprep.mubr.msk.f32.mxu1 %vm671_vm2, %v666_v18 }
 0x208   :  { %v619_v31 = vpop.f32.mrf.mxu1 }
 0x209   :  { %v271_v32 = vrot.slane %v619_v31, 1  ;;  %v294_v36 = vrot.slane %v619_v31, 2  ;;  %v337_v39 = vrot.slane %v619_v31, 3  ;;  %v380_v43 = vrot.slane %v619_v31, 4 }
 0x20a   :  { %v246_v33 = vpop.f32.mrf.mxu1 }
 0x20b   :  { %278 = vrot.lane.b32.xlu1 %v271_v32, %s667_s25  ;;  %v270_v34 = vrot.slane %v246_v33, 1  ;;  %v293_v37 = vrot.slane %v246_v33, 2  ;;  %v336_v40 = vrot.slane %v246_v33, 3  ;;  %v379_v44 = vrot.slane %v246_v33, 4 }
 0x20c   :  { %v768_v41 = vpop.f32.mrf.mxu1 }
 0x20d   :  { %v272_v35 = vsel %vm269_vm7, %v270_v34, %v271_v32  ;;  %v295_v38 = vsel %vm292_vm8, %v293_v37, %v294_v36  ;;  %v338_v42 = vsel %vm335_vm9, %v336_v40, %v337_v39  ;;  %v381_v46 = vsel %vm378_vm10, %v379_v44, %v380_v43 }
 0x20e   :  { %276 = vrot.lane.b32.xlu0 %v272_v35, %s667_s25  ;;  %v772_v45 = vpop.f32.mrf.mxu1  ;;  %v274_v47 = vrot.slane %v768_v41, 1  ;;  %v297_v50 = vrot.slane %v768_v41, 2  ;;  %v340_v53 = vrot.slane %v768_v41, 3  ;;  %v383_v56 = vrot.slane %v768_v41, 4 }
 0x20f   :  { %301 = vrot.lane.b32.xlu1 %v294_v36, %s668_s2  ;;  %v273_v48 = vrot.slane %v772_v45, 1  ;;  %v296_v51 = vrot.slane %v772_v45, 2  ;;  %v339_v54 = vrot.slane %v772_v45, 3  ;;  %v382_v57 = vrot.slane %v772_v45, 4 }
 0x211   :  { %v275_v49 = vsel %vm269_vm7, %v273_v48, %v274_v47  ;;  %v298_v52 = vsel %vm292_vm8, %v296_v51, %v297_v50  ;;  %v341_v55 = vsel %vm335_vm9, %v339_v54, %v340_v53  ;;  %v384_v58 = vsel %vm378_vm10, %v382_v57, %v383_v56 }
 0x212   :  { %299 = vrot.lane.b32.xlu0 %v295_v38, %s668_s2 }
 0x213   :  { %344 = vrot.lane.b32.xlu1 %v337_v39, %s669_s26 }
 0x216   :  { %342 = vrot.lane.b32.xlu0 %v338_v42, %s669_s26 }
 0x217   :  { %387 = vrot.lane.b32.xlu1 %v380_v43, %s670_s27 }
 0x21a   :  { %385 = vrot.lane.b32.xlu0 %v381_v46, %s670_s27 }
 0x21b   :  { %282 = vrot.lane.b32.xlu1 %v274_v47, %s667_s25 }
 0x21e   :  { %280 = vrot.lane.b32.xlu0 %v275_v49, %s667_s25 }
 0x21f   :  { %305 = vrot.lane.b32.xlu1 %v297_v50, %s668_s2 }
 0x222   :  { %303 = vrot.lane.b32.xlu0 %v298_v52, %s668_s2 }
 0x223   :  { %348 = vrot.lane.b32.xlu1 %v340_v53, %s669_s26 }
 0x226   :  { %346 = vrot.lane.b32.xlu0 %v341_v55, %s669_s26 }
 0x227   :  { %391 = vrot.lane.b32.xlu1 %v383_v56, %s670_s27  ;;  %v452_v56 = vld [vmem:[%s835_s4 + $0x10] sm:$0xff] }
 0x228   :  { %624 = vmatpush3.msra.mxu1 %v452_v56 }
 0x229   :  { %625 = vmatprep.subr.mxu1 %v666_v18 }
 0x22a   :  { %389 = vrot.lane.b32.xlu0 %v384_v58, %s670_s27 }
 0x27d   :  { %v279_v59 = vpop.permute.xlu1 %278 }
 0x27e   :  { %v289_v61 = vadd.f32 %v619_v31, %v279_v59 }
 0x280   :  { %v277_v60 = vpop.permute.xlu0 %276 }
 0x281   :  { %v302_v62 = vpop.permute.xlu1 %301  ;;  %v288_v63 = vadd.f32 %v277_v60, %v246_v33 }
 0x282   :  { %v312_v0 = vadd.f32 %v302_v62, %v289_v61 }
 0x284   :  { %v300_v1 = vpop.permute.xlu0 %299  ;;  %v318_v4 = vsel %vm317_vm11, %v312_v0, -inf }
 0x285   :  { %v311_v2 = vadd.f32 %v300_v1, %v288_v63  ;;  %v345_v3 = vpop.permute.xlu1 %344 }
 0x286   :  { %v355_v10 = vadd.f32 %v345_v3, %v312_v0 }
 0x287   :  { %v316_v5 = vsel %vm315_vm12, %v311_v2, -inf }
 0x288   :  { %v319_v6 = vmax.f32 %v316_v5, %v318_v4  ;;  %v343_v7 = vpop.permute.xlu0 %342  ;;  %v361_v16 = vsel %vm360_vm14, %v355_v10, -inf }
 0x289   :  { %v354_v8 = vadd.f32 %v343_v7, %v311_v2  ;;  %v388_v9 = vpop.permute.xlu1 %387 }
 0x28a   :  { %v320_v15 = vrot.slane %v319_v6, 4  ;;  %v398_v19 = vadd.f32 %v388_v9, %v355_v10 }
 0x28b   :  { %v359_v11 = vsel %vm358_vm13, %v354_v8, -inf }
 0x28c   :  { %v386_v12 = vpop.permute.xlu0 %385  ;;  %v362_v17 = vmax.f32 %v359_v11, %v361_v16  ;;  %v321_v24 = vmax.f32 %v319_v6, %v320_v15  ;;  %v404_v26 = vsel %vm403_vm0, %v398_v19, -inf  ;;  %v451_v6 = vld [vmem:[%s835_s4 + $0x8] sm:$0xff]  ;;  %v450_v11 = vld [vmem:[%s835_s4] sm:$0xff]  ;;  %s672_s4 = smov 88  }
 0x28d   :  { %v397_v13 = vadd.f32 %v386_v12, %v354_v8  ;;  %v283_v14 = vpop.permute.xlu1 %282  ;;  %626 = vmatpush3.msra.mxu1 %v451_v6 }
 0x28e   :  { %v291_v22 = vadd.f32 %v768_v41, %v283_v14  ;;  %v363_v25 = vrot.slane %v362_v17, 4  ;;  %v322_v33 = vrot.slane %v321_v24, 2  ;;  %627 = vmatprep.subr.mxu1 %v666_v18  ;;  %v563_v18 = vld [vmem:[%s834_s3] ss:$0 sm:$0xff]  ;;  %s643_s3 = scalar_lea.vmem %s543_s0, 32 }
 0x28f   :  { %v402_v21 = vsel %vm401_vm15, %v397_v13, -inf  ;;  %628 = vmatpush3.msra.mxu1 %v450_v11  ;;  %p644_p0 = scmp.ne.s32.totalorder %s543_s0, %s643_s3  ;;  %p649_p2 = scmp.lt.s32.totalorder %s643_s3, %s643_s3 }
 0x290   :  { %v281_v20 = vpop.permute.xlu0 %280  ;;  %v405_v29 = vmax.f32 %v402_v21, %v404_v26  ;;  %v364_v34 = vmax.f32 %v362_v17, %v363_v25  ;;  %v323_v43 = vmax.f32 %v321_v24, %v322_v33 }
 0x291   :  { %v306_v23 = vpop.permute.xlu1 %305  ;;  %v290_v27 = vadd.f32 %v281_v20, %v772_v45  ;;  %p650_p3 = por %p649_p2, %p648_p1 }
 0x292   :  { %v314_v28 = vadd.f32 %v306_v23, %v291_v22  ;;  %v406_v38 = vrot.slane %v405_v29, 4  ;;  %v365_v45 = vrot.slane %v364_v34, 2  ;;  %v324_v57 = vrot.slane %v323_v43, 1 }
 0x293   :  { %p651_p4 = pnand %p650_p3, %p644_p0 }
 0x294   :  { %v304_v30 = vpop.permute.xlu0 %303  ;;  %v327_v35 = vsel %vm317_vm11, %v314_v28, -inf  ;;  %v407_v49 = vmax.f32 %v405_v29, %v406_v38  ;;  %v366_v58 = vmax.f32 %v364_v34, %v365_v45  ;;  %v325_v5 = vmax.f32 %v323_v43, %v324_v57 }
 0x295   :  { %v313_v31 = vadd.f32 %v304_v30, %v290_v27  ;;  %v349_v32 = vpop.permute.xlu1 %348 }
 0x296   :  { %v357_v37 = vadd.f32 %v349_v32, %v314_v28  ;;  %v408_v61 = vrot.slane %v407_v49, 2  ;;  %v367_v4 = vrot.slane %v366_v58, 1 }
 0x297   :  { %v326_v36 = vsel %vm315_vm12, %v313_v31, -inf }
 0x298   :  { %v328_v39 = vmax.f32 %v326_v36, %v327_v35  ;;  %v347_v40 = vpop.permute.xlu0 %346  ;;  %v370_v46 = vsel %vm360_vm14, %v357_v37, -inf  ;;  %v409_v7 = vmax.f32 %v407_v49, %v408_v61  ;;  %v368_v16 = vmax.f32 %v366_v58, %v367_v4 }
 0x299   :  { %v356_v41 = vadd.f32 %v347_v40, %v313_v31  ;;  %v392_v42 = vpop.permute.xlu1 %391  ;;  %v564_v31 = vld [vmem:[%s836_s5] ss:$0 sm:$0xff] }
 0x29a   :  { %v329_v44 = vrot.slane %v328_v39, 4  ;;  %v400_v48 = vadd.f32 %v392_v42, %v357_v37  ;;  %v410_v19 = vrot.slane %v409_v7, 1 }
 0x29b   :  { %v369_v47 = vsel %vm358_vm13, %v356_v41, -inf }
 0x29c   :  { %v330_v50 = vmax.f32 %v328_v39, %v329_v44  ;;  %v371_v51 = vmax.f32 %v369_v47, %v370_v46  ;;  %v390_v52 = vpop.permute.xlu0 %389  ;;  %v413_v59 = vsel %vm403_vm0, %v400_v48, -inf  ;;  %v411_v22 = vmax.f32 %v409_v7, %v410_v19 }
 0x29d   :  { %v399_v53 = vadd.f32 %v390_v52, %v356_v41 }
 0x29e   :  { %v331_v54 = vrot.slane %v330_v50, 2  ;;  %v372_v55 = vrot.slane %v371_v51, 4 }
 0x29f   :  { %v412_v60 = vsel %vm401_vm15, %v399_v53, -inf }
 0x2a0   :  { %v332_v62 = vmax.f32 %v330_v50, %v331_v54  ;;  %v373_v63 = vmax.f32 %v371_v51, %v372_v55  ;;  %v414_v0 = vmax.f32 %v412_v60, %v413_v59 }
 0x2a2   :  { %v333_v1 = vrot.slane %v332_v62, 1  ;;  %v374_v2 = vrot.slane %v373_v63, 2  ;;  %v415_v3 = vrot.slane %v414_v0, 4 }
 0x2a4   :  { %v375_v8 = vmax.f32 %v373_v63, %v374_v2  ;;  %v416_v9 = vmax.f32 %v414_v0, %v415_v3  ;;  %v334_v10 = vmax.f32 %v332_v62, %v333_v1 }
 0x2a6   :  { %v417_v12 = vrot.slane %v416_v9, 2  ;;  %v376_v13 = vrot.slane %v375_v8, 1  ;;  %v424_v14 = vsel %vm423_vm1, %v334_v10, %v325_v5 }
 0x2a8   :  { %v418_v15 = vmax.f32 %v416_v9, %v417_v12  ;;  %v377_v17 = vmax.f32 %v375_v8, %v376_v13 }
 0x2aa   :  { %v428_v20 = vsel %vm423_vm1, %v377_v17, %v368_v16  ;;  %v419_v21 = vrot.slane %v418_v15, 1 }
 0x2ab   :  { %429 = vrot.lane.b32.xlu0 %v428_v20, %s668_s2 }
 0x2ac   :  { %v420_v23 = vmax.f32 %v418_v15, %v419_v21 }
 0x2ae   :  { %v434_v24 = vsel %vm423_vm1, %v420_v23, %v411_v22 }
 0x2af   :  { %435 = vrot.lane.b32.xlu1 %v434_v24, %s672_s4 }
 0x31d   :  { %v430_v25 = vpop.permute.xlu0 %429 }
 0x31e   :  { %v438_v26 = vsel %vm315_vm12, %v424_v14, %v430_v25 }
 0x321   :  { %v436_v27 = vpop.permute.xlu1 %435 }
 0x322   :  { %v440_v28 = vsel %vm439_vm3, %v438_v26, %v436_v27 }
 0x323   :  { %v448_v29 = vadd.f32 %v563_v18, %v440_v28 }
 0x325   :  { %v449_v30 = vmax.f32 %v448_v29, 0.0 }
 0x327   :  { %630 = vmatmul.mubr.msk.f32.vlgmr.msra.gmra.mxu1 %vm460_vm4, %v449_v30 }
 0x3e7   :  { %v530_v32 = vpop.f32.mrf.mxu1 }
 0x3e8   :  { %v531_v33 = vadd.f32 %v564_v31, %v530_v32 }
 0x3e9   :  { %v631_v34 = vpop.f32.mrf.mxu1 }
 0x3ea   :  { %535 = vst.msk [vmem:[#allocation2] sm:$0x3] %vm534_vm5, %v531_v33 }
 0x3eb   :  { %654 = shalt.err (!%p651_p4)
}
 0x3ec   :  { %545 = dma.vmem_to_hbm [thread:$0]  %s543_s0, 32, %s837_s6, [#allocation3]  }
 0x3ed   :  { %663 = dma.done.wait [#allocation3], 32  }
 0x3ee   :  { %664 = vsyncadd [#allocation3], 4294967264 }
 0x3ef   :  { %549 = vsyncpa [#allocation3], 1 }

</bundles_post_ra>
